<compile_context>
chip_gen: v7x
topology: tpu7x:2x2x1
jax: 0.10.0
libtpu: 0.0.40
codegen_flags: <defaults>
</compile_context>

<pallas_src>
import functools

import jax
import jax.numpy as jnp
from jax import lax
from jax.experimental import pallas as pl
from jax.experimental.pallas import tpu as pltpu


def _round_up(x: int, m: int) -> int:
    return (x + m - 1) // m * m


def _mse_kernel(pred_ref, gt_ref, out_ref, *, inv_n):
    """One (row-tile) step: accumulate sum((onehot - pred)^2) into out_ref.

    pred_ref: (TB, 8, C) native dtype   gt_ref: (TB, 8, 1) int32
    out_ref : (1, 8, C) f32 accumulator (resident across the inner grid axis).
    """
    t = pl.program_id(1)

    @pl.when(t == 0)
    def _init():
        out_ref[...] = jnp.zeros_like(out_ref)

    pred = pred_ref[...].astype(jnp.float32)                 # in-kernel upcast
    labels = gt_ref[...]                                     # (TB, 8, 1) int32

    # One-hot target built in-kernel: class-index iota vs label broadcast.
    col = lax.broadcasted_iota(jnp.int32, pred.shape, dimension=2)
    onehot = (col == labels).astype(jnp.float32)             # (TB, 8, C)

    diff = onehot - pred
    sq = diff * diff

    # Keep the partial sum vreg-shaped: reduce only over the leading vreg-block
    # axis (pure VPU adds).  The final cross-lane/sublane reduce happens once,
    # on the tiny (num_shards, 8, C) output, in the JAX wrapper.
    part = jnp.sum(sq, axis=0)                               # (8, C) f32
    out_ref[...] += part[None, :, :]

    @pl.when(t == pl.num_programs(1) - 1)
    def _finalize():
        out_ref[...] = out_ref[...] * jnp.float32(inv_n)


def mse_loss(pred: jax.Array, gt: jax.Array) -> jax.Array:
    """pred: (N, *, C) float, gt: (N, *) int labels in [0, C).  Returns scalar f32.

    loss = sum((one_hot(gt) - pred)^2) / N   with N = pred.shape[0].
    """
    c = pred.shape[-1]
    n_div = pred.shape[0]                       # divide by leading batch dim (torch semantics)
    m = 1
    for d in pred.shape[:-1]:
        m *= d

    pred2 = pred.reshape(m, c)                  # keep native dtype (no f32 copy in HBM)
    gt1 = gt.reshape(m).astype(jnp.int32)

    itemsize = pred2.dtype.itemsize
    lane_c = _round_up(c, 128)                  # VMEM lane padding of the class axis
    # VMEM bytes per row for one (pred + label) buffer pair.
    bytes_per_row = lane_c * itemsize + 128 * 4
    tile_budget = 8 * 1024 * 1024               # ~8 MiB of rows per single buffer pair
    tile_n = max(8, (tile_budget // bytes_per_row) // 8 * 8)

    rows = _round_up(m, 8)
    tile_n = min(tile_n, rows)

    num_tiles = pl.cdiv(rows, tile_n)
    num_shards = 2 if num_tiles >= 2 else 1     # shard the reduction across v7x's 2 TCs
    tiles_per_shard = pl.cdiv(num_tiles, num_shards)
    m_pad = num_shards * tiles_per_shard * tile_n

    if m_pad != m:
        # Padded rows: label = -1 -> all-zero one-hot, pred = 0 -> zero contribution.
        pred2 = jnp.pad(pred2, ((0, m_pad - m), (0, 0)))
        gt1 = jnp.pad(gt1, (0, m_pad - m), constant_values=-1)

    tb = tile_n // 8
    pred3 = pred2.reshape(m_pad // 8, 8, c)     # layout plumbing only (row-major reshape)
    gt3 = gt1.reshape(m_pad // 8, 8, 1)

    kernel = functools.partial(_mse_kernel, inv_n=1.0 / float(n_div))

    grid = (num_shards, tiles_per_shard)
    cost = pl.CostEstimate(
        flops=6 * m * c,
        transcendentals=0,
        bytes_accessed=m * c * itemsize + m * 4 + num_shards * 8 * c * 4,
    )

    partials = pl.pallas_call(
        kernel,
        out_shape=jax.ShapeDtypeStruct((num_shards, 8, c), jnp.float32),
        grid_spec=pltpu.PrefetchScalarGridSpec(
            num_scalar_prefetch=0,
            grid=grid,
            in_specs=[
                pl.BlockSpec((tb, 8, c), lambda s, t: (s * tiles_per_shard + t, 0, 0)),
                pl.BlockSpec((tb, 8, 1), lambda s, t: (s * tiles_per_shard + t, 0, 0)),
            ],
            out_specs=pl.BlockSpec((1, 8, c), lambda s, t: (s, 0, 0)),
        ),
        compiler_params=pltpu.CompilerParams(
            dimension_semantics=("parallel", "arbitrary"),
            vmem_limit_bytes=32 * 1024 * 1024,
        ),
        cost_estimate=cost,
    )(pred3, gt3)

    # Tiny final reduction over (num_shards, 8, C) partials (already scaled by 1/N).
    return jnp.sum(partials)


if __name__ == "__main__":
    key = jax.random.PRNGKey(0)
    k_pred, k_gt = jax.random.split(key)

    # Small example consistent with the module's default (class_num=2).
    N, CLASS_NUM = 8, 2
    pred = jax.random.normal(k_pred, (N, CLASS_NUM), dtype=jnp.float32)
    gt = jax.random.randint(k_gt, (N,), 0, CLASS_NUM, dtype=jnp.int32)

    loss = mse_loss(pred, gt)
    jax.block_until_ready(loss)

    onehot_ref = jnp.eye(CLASS_NUM, dtype=jnp.float32)[gt]
    ref = jnp.sum((onehot_ref - pred) ** 2) / N
    assert jnp.allclose(loss, ref, rtol=1e-6, atol=1e-6), (loss, ref)

    # Secondary check exercising the tiled / 2-shard / padded path.
    k_pred2, k_gt2 = jax.random.split(jax.random.PRNGKey(1))
    N2, C2 = 9000, 4
    pred_b = jax.random.normal(k_pred2, (N2, C2), dtype=jnp.float32)
    gt_b = jax.random.randint(k_gt2, (N2,), 0, C2, dtype=jnp.int32)
    loss_b = mse_loss(pred_b, gt_b)
    jax.block_until_ready(loss_b)
    onehot_b = jnp.eye(C2, dtype=jnp.float32)[gt_b]
    ref_b = jnp.sum((onehot_b - pred_b) ** 2) / N2
    assert jnp.allclose(loss_b, ref_b, rtol=1e-4, atol=1e-4), (loss_b, ref_b)

    # TODO(synk): MSE.backward (analytic gradient) is not implemented; forward only.
    print("KERNEL_OK")
</pallas_src>

<mosaic_0001>
module attributes {stable_mosaic.version = 11 : i64} {
  func.func @_mse_kernel(%arg0: i32, %arg1: i32, %arg2: memref<1x8x2xf32, #tpu.memory_space<vmem>>, %arg3: memref<1x8x1xi32, #tpu.memory_space<vmem>>, %arg4: memref<1x8x2xf32, #tpu.memory_space<vmem>>) attributes {dimension_semantics = [#tpu.dimension_semantics<parallel>, #tpu.dimension_semantics<arbitrary>], iteration_bounds = array<i64: 1, 1>, scalar_prefetch = 0 : i64, scratch_operands = 0 : i64, tpu.core_type = #tpu.core_type<tc>, window_params = [{transform_indices = @transform_0, window_bounds = array<i64: 1, 8, 2>}, {transform_indices = @transform_1, window_bounds = array<i64: 1, 8, 1>}, {transform_indices = @transform_2, window_bounds = array<i64: 1, 8, 2>}]} {
    %c0_i32 = arith.constant 0 : i32
    %0 = arith.cmpi eq, %arg1, %c0_i32 : i32
    %1 = arith.extui %0 : i1 to i32
    %c0_i32_0 = arith.constant 0 : i32
    %2 = arith.cmpi ne, %1, %c0_i32_0 : i32
    scf.if %2 {
      %cst_14 = arith.constant 0.000000e+00 : f32
      %20 = vector.broadcast %cst_14 : f32 to vector<1x8x2xf32>
      %c0_15 = arith.constant 0 : index
      %c0_16 = arith.constant 0 : index
      %c0_17 = arith.constant 0 : index
      %21 = vector.load %arg4[%c0_15, %c0_16, %c0_17] : memref<1x8x2xf32, #tpu.memory_space<vmem>>, vector<1x8x2xf32>
      tpu.vector_store %arg4[%c0_15, %c0_16, %c0_17], %20 {strides = array<i32>} : memref<1x8x2xf32, #tpu.memory_space<vmem>>, vector<1x8x2xf32>,
    } else {
    }
    %c0 = arith.constant 0 : index
    %c0_1 = arith.constant 0 : index
    %c0_2 = arith.constant 0 : index
    %3 = vector.load %arg2[%c0, %c0_1, %c0_2] : memref<1x8x2xf32, #tpu.memory_space<vmem>>, vector<1x8x2xf32>
    %c0_3 = arith.constant 0 : index
    %c0_4 = arith.constant 0 : index
    %c0_5 = arith.constant 0 : index
    %4 = vector.load %arg3[%c0_3, %c0_4, %c0_5] : memref<1x8x1xi32, #tpu.memory_space<vmem>>, vector<1x8x1xi32>
    %5 = tpu.iota {dimensions = array<i32: 2>} : vector<1x8x2xi32>
    %6 = vector.broadcast %4 : vector<1x8x1xi32> to vector<1x8x2xi32>
    %7 = arith.cmpi eq, %5, %6 : vector<1x8x2xi32>
    %8 = arith.extui %7 : vector<1x8x2xi1> to vector<1x8x2xi32>
    %9 = arith.sitofp %8 : vector<1x8x2xi32> to vector<1x8x2xf32>
    %10 = arith.subf %9, %3 : vector<1x8x2xf32>
    %11 = arith.mulf %10, %10 : vector<1x8x2xf32>
    %cst = arith.constant dense<0.000000e+00> : vector<8x2xf32>
    %12 = vector.multi_reduction <add>, %11, %cst [0] : vector<1x8x2xf32> to vector<8x2xf32>
    %c0_6 = arith.constant 0 : index
    %c0_7 = arith.constant 0 : index
    %c0_8 = arith.constant 0 : index
    %13 = vector.load %arg4[%c0_6, %c0_7, %c0_8] : memref<1x8x2xf32, #tpu.memory_space<vmem>>, vector<1x8x2xf32>
    %14 = vector.shape_cast %12 : vector<8x2xf32> to vector<1x8x2xf32>
    %15 = arith.addf %13, %14 : vector<1x8x2xf32>
    %c0_9 = arith.constant 0 : index
    %c0_10 = arith.constant 0 : index
    %c0_11 = arith.constant 0 : index
    %16 = vector.load %arg4[%c0_9, %c0_10, %c0_11] : memref<1x8x2xf32, #tpu.memory_space<vmem>>, vector<1x8x2xf32>
    tpu.vector_store %arg4[%c0_9, %c0_10, %c0_11], %15 {strides = array<i32>} : memref<1x8x2xf32, #tpu.memory_space<vmem>>, vector<1x8x2xf32>,
    %c0_i32_12 = arith.constant 0 : i32
    %17 = arith.cmpi eq, %arg1, %c0_i32_12 : i32
    %18 = arith.extui %17 : i1 to i32
    %c0_i32_13 = arith.constant 0 : i32
    %19 = arith.cmpi ne, %18, %c0_i32_13 : i32
    scf.if %19 {
      %c0_14 = arith.constant 0 : index
      %c0_15 = arith.constant 0 : index
      %c0_16 = arith.constant 0 : index
      %20 = vector.load %arg4[%c0_14, %c0_15, %c0_16] : memref<1x8x2xf32, #tpu.memory_space<vmem>>, vector<1x8x2xf32>
      %cst_17 = arith.constant 1.250000e-01 : f32
      %21 = vector.broadcast %cst_17 : f32 to vector<1x8x2xf32>
      %22 = arith.mulf %20, %21 : vector<1x8x2xf32>
      %c0_18 = arith.constant 0 : index
      %c0_19 = arith.constant 0 : index
      %c0_20 = arith.constant 0 : index
      %23 = vector.load %arg4[%c0_18, %c0_19, %c0_20] : memref<1x8x2xf32, #tpu.memory_space<vmem>>, vector<1x8x2xf32>
      tpu.vector_store %arg4[%c0_18, %c0_19, %c0_20], %22 {strides = array<i32>} : memref<1x8x2xf32, #tpu.memory_space<vmem>>, vector<1x8x2xf32>,
    } else {
    }
    return
  }
  func.func @transform_0(%arg0: i32, %arg1: i32) -> (i32, i32, i32) {
    %c1_i32 = arith.constant 1 : i32
    %0 = arith.muli %arg0, %c1_i32 : i32
    %1 = arith.addi %0, %arg1 : i32
    %c0_i32 = arith.constant 0 : i32
    %c0_i32_0 = arith.constant 0 : i32
    %c0_i32_1 = arith.constant 0 : i32
    return %1, %c0_i32, %c0_i32_0 : i32, i32, i32
  }
  func.func @transform_1(%arg0: i32, %arg1: i32) -> (i32, i32, i32) {
    %c1_i32 = arith.constant 1 : i32
    %0 = arith.muli %arg0, %c1_i32 : i32
    %1 = arith.addi %0, %arg1 : i32
    %c0_i32 = arith.constant 0 : i32
    %c0_i32_0 = arith.constant 0 : i32
    %c0_i32_1 = arith.constant 0 : i32
    return %1, %c0_i32, %c0_i32_0 : i32, i32, i32
  }
  func.func @transform_2(%arg0: i32, %arg1: i32) -> (i32, i32, i32) {
    %c0_i32 = arith.constant 0 : i32
    %c0_i32_0 = arith.constant 0 : i32
    %c0_i32_1 = arith.constant 0 : i32
    return %arg0, %c0_i32, %c0_i32_0 : i32, i32, i32
  }
}

</mosaic_0001>

<bundles_post_ra>
// kernel: tpu_custom_call.1
= control target key start
LH: loop header
LB: loop body
LE: loop exit
PB: predicated region body
PF: predicated region fallthrough
CT: control target
= control target key end

     0   :  { %vm49_vm0 = vcmask 15360   ;;  %v94_v0 = vmov 0   ;;  %v95_v2 = vmov 0.0   ;;  %v53_v3 = vlaneseq  ;;  %s135_s1 = inlined_call_operand.vmem [shape: s32[1,8,1], index: 1, kind: input, shape index: {}]   ;;  %s136_s2 = inlined_call_operand.vmem [shape: f32[1,8,2], index: 2, kind: output, shape index: {}]   ;;  %s137_s0 = inlined_call_operand.vmem [shape: f32[1,8,2], index: 0, kind: input, shape index: {}]  }
   0x1   :  { %93 = vset.pattern.permute.xlu0 %v94_v0  ;;  %v52_v1 = vld [vmem:[%s135_s1] sm:$0xff]  ;;  %50 = vst.msk [vmem:[%s136_s2] sm:$0xff] %vm49_vm0, %v95_v2 }
   0x2   :  { %56 = vperm.xlu0 %93, %v52_v1   ;;  %v54_v4 = vand.u32 127, %v53_v3  ;;  %v51_v6 = vld [vmem:[%s137_s0] sm:$0xff] }
   0x8   :  { %v64_v9 = vld [vmem:[%s136_s2] sm:$0xff] }
  0x81   :  { %v57_v5 = vpop.permute.xlu0 %56 }
  0x82   :  { %vm58_vm1 = vcmp.eq.s32.totalorder %v54_v4, %v57_v5 }
  0x83   :  { %v90_v7 = vsel %vm58_vm1, 1.0, %v95_v2 }
  0x84   :  { %v61_v8 = vsub.f32 %v90_v7, %v51_v6 }
  0x86   :  { %v62_v10 = vmul.f32 %v61_v8, %v61_v8 }
  0x88   :  { %v65_v11 = vadd.f32 %v64_v9, %v62_v10 }
  0x8a   :  { %67 = vst.msk [vmem:[%s136_s2] sm:$0xff] %vm49_vm0, %v65_v11 }
  0x91   :  { %v71_v12 = vld [vmem:[%s136_s2] sm:$0xff] }
  0x92   :  { %v72_v13 = vmul.f32 0.125, %v71_v12 }
  0x94   :  { %73 = vst.msk [vmem:[%s136_s2] sm:$0xff] %vm49_vm0, %v72_v13 }

</bundles_post_ra>
